<compile_context>
chip_gen: v5e
topology: v5e:2x2
jax: 0.10.0
libtpu: 0.0.40
codegen_flags: <defaults>
</compile_context>

<pallas_src>
import functools

import jax
import jax.numpy as jnp
from jax.experimental import pallas as pl
from jax.experimental.pallas import tpu as pltpu


def _triplet_kernel(r_ref, a_ref, p_ref, n_ref, out_ref, acc_ref,
                    *, margin, batch_true, tile_b, has_pad):
    i = pl.program_id(0)

    @pl.when(i == 0)
    def _():
        acc_ref[...] = jnp.zeros_like(acc_ref)

    a = a_ref[...]
    p = p_ref[...]
    n = n_ref[...]
    if a.dtype != jnp.float32:          # trace-time branch: cast only if needed
        a = a.astype(jnp.float32)
        p = p.astype(jnp.float32)
        n = n.astype(jnp.float32)

    # Fused distance difference: one elementwise pass + one cross-lane reduce.
    sq = (a - p) ** 2 - (a - n) ** 2
    diff = jnp.sum(sq, axis=1, keepdims=True)            # (tile_b, 1)

    r = r_ref[0]
    losses = jnp.maximum(diff + (jnp.float32(margin) + r), 0.0)

    if has_pad:
        # Zero out padded tail rows so they don't contribute relu(margin + r).
        row = jax.lax.broadcasted_iota(jnp.int32, (tile_b, 1), 0) + i * tile_b
        losses = jnp.where(row < batch_true, losses, 0.0)

    # Elementwise VMEM accumulation; collapse to a scalar only at the end.
    acc_ref[...] = acc_ref[...] + losses

    @pl.when(i == pl.num_programs(0) - 1)
    def _():
        out_ref[0] = jnp.sum(acc_ref[...]) / jnp.float32(batch_true)


def _choose_tile_b(B, D, itemsize):
    """Largest batch tile whose double-buffered input footprint fits VMEM."""
    # 3 inputs x 2 pipeline buffers x tile_b x D x itemsize <= ~36 MiB
    # (leaves plenty of headroom on v7x's 64 MiB physical VMEM).
    input_budget = 36 * 1024 * 1024
    per_row = 3 * 2 * D * itemsize
    tile = input_budget // per_row
    align = 16 if itemsize < 4 else 8           # bf16 sublane packing
    tile = max(align, min(int(tile), 2048))
    tile = (tile // align) * align
    if B <= tile:                               # single tile: just pad B up
        tile = max(align, ((B + align - 1) // align) * align)
    return tile


def triplet_margin_loss_rscore(anchor, positive, negative, r_score,
                               margin=1.0, tile_b=None):
    B, D = anchor.shape
    itemsize = jnp.dtype(anchor.dtype).itemsize
    if tile_b is None:
        tile_b = _choose_tile_b(B, D, itemsize)

    num_tiles = pl.cdiv(B, tile_b)
    B_pad = num_tiles * tile_b
    has_pad = B_pad != B
    if has_pad:
        pad = ((0, B_pad - B), (0, 0))
        anchor = jnp.pad(anchor, pad)
        positive = jnp.pad(positive, pad)
        negative = jnp.pad(negative, pad)

    r = jnp.asarray(r_score, jnp.float32).reshape((1,))

    kernel = functools.partial(_triplet_kernel, margin=float(margin),
                               batch_true=B, tile_b=tile_b, has_pad=has_pad)

    out = pl.pallas_call(
        kernel,
        out_shape=jax.ShapeDtypeStruct((1,), jnp.float32),
        grid_spec=pltpu.PrefetchScalarGridSpec(
            num_scalar_prefetch=0,
            grid=(num_tiles,),
            in_specs=[
                pl.BlockSpec(memory_space=pltpu.SMEM),          # r_score scalar
                pl.BlockSpec((tile_b, D), lambda i: (i, 0)),    # anchor
                pl.BlockSpec((tile_b, D), lambda i: (i, 0)),    # positive
                pl.BlockSpec((tile_b, D), lambda i: (i, 0)),    # negative
            ],
            out_specs=pl.BlockSpec(memory_space=pltpu.SMEM),    # scalar loss
            scratch_shapes=[pltpu.VMEM((tile_b, 1), jnp.float32)],
        ),
        compiler_params=pltpu.CompilerParams(
            dimension_semantics=("arbitrary",),
            vmem_limit_bytes=48 * 1024 * 1024,   # raise v5e's 16 MiB default,
                                                 # stay under v7x's 64 MiB
        ),
    )(r, anchor, positive, negative)
    return out[0]


def _reference(anchor, positive, negative, r_score, margin=1.0):
    dp = jnp.sum((anchor - positive) ** 2, axis=1)
    dn = jnp.sum((anchor - negative) ** 2, axis=1)
    losses = jax.nn.relu(dp - dn + margin + r_score)
    return jnp.mean(losses)


if __name__ == "__main__":
    key = jax.random.PRNGKey(0)
    k1, k2, k3 = jax.random.split(key, 3)
    r_score = jnp.float32(0.25)
    D = 128

    # Case 1: batch is an exact tile multiple.
    B = 16
    anchor = jax.random.normal(k1, (B, D), jnp.float32)
    positive = jax.random.normal(k2, (B, D), jnp.float32)
    negative = jax.random.normal(k3, (B, D), jnp.float32)
    out = triplet_margin_loss_rscore(anchor, positive, negative, r_score,
                                     margin=1.0)
    out = jax.block_until_ready(out)
    ref = _reference(anchor, positive, negative, r_score, margin=1.0)
    assert jnp.allclose(out, ref, rtol=1e-5, atol=1e-5), (out, ref)

    # Case 2: ragged batch (exercises the padding + in-kernel row mask path).
    B2 = 20
    a2 = jax.random.normal(k1, (B2, D), jnp.float32)
    p2 = jax.random.normal(k2, (B2, D), jnp.float32)
    n2 = jax.random.normal(k3, (B2, D), jnp.float32)
    out2 = triplet_margin_loss_rscore(a2, p2, n2, r_score, margin=1.0)
    out2 = jax.block_until_ready(out2)
    ref2 = _reference(a2, p2, n2, r_score, margin=1.0)
    assert jnp.allclose(out2, ref2, rtol=1e-5, atol=1e-5), (out2, ref2)

    print("KERNEL_OK")
</pallas_src>

<mosaic_0001>
module attributes {stable_mosaic.version = 11 : i64} {
  func.func @_triplet_kernel(%arg0: i32, %arg1: memref<1xf32, #tpu.memory_space<smem>>, %arg2: memref<16x128xf32, #tpu.memory_space<vmem>>, %arg3: memref<16x128xf32, #tpu.memory_space<vmem>>, %arg4: memref<16x128xf32, #tpu.memory_space<vmem>>, %arg5: memref<1xf32, #tpu.memory_space<smem>>, %arg6: memref<16x1xf32, #tpu.memory_space<vmem>>) attributes {dimension_semantics = [#tpu.dimension_semantics<arbitrary>], iteration_bounds = array<i64: 1>, scalar_prefetch = 0 : i64, scratch_operands = 1 : i64, tpu.core_type = #tpu.core_type<tc>, window_params = [{transform_indices = @transform_0, window_bounds = array<i64: 1>}, {transform_indices = @transform_1, window_bounds = array<i64: 16, 128>}, {transform_indices = @transform_2, window_bounds = array<i64: 16, 128>}, {transform_indices = @transform_3, window_bounds = array<i64: 16, 128>}, {transform_indices = @transform_4, window_bounds = array<i64: 1>}]} {
    %c0_i32 = arith.constant 0 : i32
    %0 = arith.cmpi eq, %arg0, %c0_i32 : i32
    %1 = arith.extui %0 : i1 to i32
    %c0_i32_0 = arith.constant 0 : i32
    %2 = arith.cmpi ne, %1, %c0_i32_0 : i32
    scf.if %2 {
      %cst_15 = arith.constant 0.000000e+00 : f32
      %25 = vector.broadcast %cst_15 : f32 to vector<16x1xf32>
      %c0_16 = arith.constant 0 : index
      %c0_17 = arith.constant 0 : index
      %26 = vector.load %arg6[%c0_16, %c0_17] : memref<16x1xf32, #tpu.memory_space<vmem>>, vector<16x1xf32>
      tpu.vector_store %arg6[%c0_16, %c0_17], %25 {strides = array<i32>} : memref<16x1xf32, #tpu.memory_space<vmem>>, vector<16x1xf32>,
    } else {
    }
    %c0 = arith.constant 0 : index
    %c0_1 = arith.constant 0 : index
    %3 = vector.load %arg2[%c0, %c0_1] : memref<16x128xf32, #tpu.memory_space<vmem>>, vector<16x128xf32>
    %c0_2 = arith.constant 0 : index
    %c0_3 = arith.constant 0 : index
    %4 = vector.load %arg3[%c0_2, %c0_3] : memref<16x128xf32, #tpu.memory_space<vmem>>, vector<16x128xf32>
    %c0_4 = arith.constant 0 : index
    %c0_5 = arith.constant 0 : index
    %5 = vector.load %arg4[%c0_4, %c0_5] : memref<16x128xf32, #tpu.memory_space<vmem>>, vector<16x128xf32>
    %6 = arith.subf %3, %4 : vector<16x128xf32>
    %7 = arith.mulf %6, %6 : vector<16x128xf32>
    %8 = arith.subf %3, %5 : vector<16x128xf32>
    %9 = arith.mulf %8, %8 : vector<16x128xf32>
    %10 = arith.subf %7, %9 : vector<16x128xf32>
    %cst = arith.constant dense<0.000000e+00> : vector<16xf32>
    %11 = vector.multi_reduction <add>, %10, %cst [1] : vector<16x128xf32> to vector<16xf32>
    %12 = vector.shape_cast %11 : vector<16xf32> to vector<16x1xf32>
    %c0_6 = arith.constant 0 : index
    %13 = memref.load %arg1[%c0_6] : memref<1xf32, #tpu.memory_space<smem>>
    %cst_7 = arith.constant 1.000000e+00 : f32
    %14 = arith.addf %cst_7, %13 : f32
    %15 = vector.broadcast %14 : f32 to vector<16x1xf32>
    %16 = arith.addf %12, %15 : vector<16x1xf32>
    %cst_8 = arith.constant 0.000000e+00 : f32
    %17 = vector.broadcast %cst_8 : f32 to vector<16x1xf32>
    %18 = arith.maximumf %16, %17 : vector<16x1xf32>
    %c0_9 = arith.constant 0 : index
    %c0_10 = arith.constant 0 : index
    %19 = vector.load %arg6[%c0_9, %c0_10] : memref<16x1xf32, #tpu.memory_space<vmem>>, vector<16x1xf32>
    %20 = arith.addf %19, %18 : vector<16x1xf32>
    %c0_11 = arith.constant 0 : index
    %c0_12 = arith.constant 0 : index
    %21 = vector.load %arg6[%c0_11, %c0_12] : memref<16x1xf32, #tpu.memory_space<vmem>>, vector<16x1xf32>
    tpu.vector_store %arg6[%c0_11, %c0_12], %20 {strides = array<i32>} : memref<16x1xf32, #tpu.memory_space<vmem>>, vector<16x1xf32>,
    %c0_i32_13 = arith.constant 0 : i32
    %22 = arith.cmpi eq, %arg0, %c0_i32_13 : i32
    %23 = arith.extui %22 : i1 to i32
    %c0_i32_14 = arith.constant 0 : i32
    %24 = arith.cmpi ne, %23, %c0_i32_14 : i32
    scf.if %24 {
      %c0_15 = arith.constant 0 : index
      %c0_16 = arith.constant 0 : index
      %25 = vector.load %arg6[%c0_15, %c0_16] : memref<16x1xf32, #tpu.memory_space<vmem>>, vector<16x1xf32>
      %26 = vector.shape_cast %25 : vector<16x1xf32> to vector<1x16x1xf32>
      %cst_17 = arith.constant dense<0.000000e+00> : vector<1xf32>
      %27 = vector.multi_reduction <add>, %26, %cst_17 [1, 2] : vector<1x16x1xf32> to vector<1xf32>
      %28 = vector.shape_cast %27 : vector<1xf32> to vector<1x1x1xf32>
      %29 = vector.extract %28[0, 0, 0] : f32 from vector<1x1x1xf32>
      %cst_18 = arith.constant 1.600000e+01 : f32
      %30 = arith.divf %29, %cst_18 : f32
      %c0_19 = arith.constant 0 : index
      %31 = memref.load %arg5[%c0_19] : memref<1xf32, #tpu.memory_space<smem>>
      memref.store %30, %arg5[%c0_19] : memref<1xf32, #tpu.memory_space<smem>>
    } else {
    }
    return
  }
  func.func @transform_0(%arg0: i32) -> i32 {
    %c0_i32 = arith.constant 0 : i32
    %c0_i32_0 = arith.constant 0 : i32
    return %c0_i32 : i32
  }
  func.func @transform_1(%arg0: i32) -> (i32, i32) {
    %c0_i32 = arith.constant 0 : i32
    %c0_i32_0 = arith.constant 0 : i32
    return %arg0, %c0_i32 : i32, i32
  }
  func.func @transform_2(%arg0: i32) -> (i32, i32) {
    %c0_i32 = arith.constant 0 : i32
    %c0_i32_0 = arith.constant 0 : i32
    return %arg0, %c0_i32 : i32, i32
  }
  func.func @transform_3(%arg0: i32) -> (i32, i32) {
    %c0_i32 = arith.constant 0 : i32
    %c0_i32_0 = arith.constant 0 : i32
    return %arg0, %c0_i32 : i32, i32
  }
  func.func @transform_4(%arg0: i32) -> i32 {
    %c0_i32 = arith.constant 0 : i32
    %c0_i32_0 = arith.constant 0 : i32
    return %c0_i32 : i32
  }
}

</mosaic_0001>

<bundles_post_ra>
// kernel: tpu_custom_call.1
= control target key start
LH: loop header
LB: loop body
LE: loop exit
PB: predicated region body
PF: predicated region fallthrough
CT: control target
= control target key end

     0   :  { %10 = vsyncpa [#allocation5], 0  ;;  %s310_s0 = inlined_call_operand.<no memory space> [shape: f32[1], index: 0, kind: input, shape index: {}]   ;;  %s311_s1 = inlined_call_operand.hbm [shape: f32[16,128], index: 1, kind: input, shape index: {}]   ;;  %s312_s2 = inlined_call_operand.hbm [shape: f32[16,128], index: 2, kind: input, shape index: {}]   ;;  %s313_s3 = inlined_call_operand.hbm [shape: f32[16,128], index: 3, kind: input, shape index: {}]   ;;  %s314_s4 = inlined_call_operand.hbm [shape: f32[1], index: 4, kind: output, shape index: {}]  }
   0x1   :  { %11 = vsyncpa [#allocation8], 0 }
   0x2   :  { %12 = vsyncpa [#allocation6], 0  ;;  %s32_s17 = sshll.u32 %s312_s2, 4  ;;  %s256_s18 = smov [#allocation7]   ;;  %s33_s17 = int_to_ptr.hbm [resolvable:$true] %s32_s17 }
   0x3   :  { %s34_s19 = sshll.u32 %s256_s18, 4  ;;  %s19_s22 = sshll.u32 %s311_s1, 4  ;;  %s35_s19 = int_to_ptr.vmem [resolvable:$true] %s34_s19  ;;  %s20_s22 = int_to_ptr.hbm [resolvable:$true] %s19_s22 }
   0x4   :  { %s257_s23 = smov 128   ;;  %s258_s24 = smov 8  }
   0x5   :  { %40 = dma.hbm_to_vmem [thread:$0]  %s33_s17, 256, %s35_s19, [#allocation8], %s257_s23, %s257_s23, %s258_s24  }
   0x6   :  { %s259_s25 = smov [#allocation4]   ;;  %s45_s29 = sshll.u32 %s313_s3, 4  ;;  %s46_s29 = int_to_ptr.hbm [resolvable:$true] %s45_s29 }
   0x7   :  { %s21_s26 = sshll.u32 %s259_s25, 4  ;;  %s260_s2 = smov [#allocation9]   ;;  %s22_s26 = int_to_ptr.vmem [resolvable:$true] %s21_s26 }
   0x8   :  { %27 = dma.hbm_to_vmem [thread:$0]  %s20_s22, 256, %s22_s26, [#allocation5], %s257_s23, %s257_s23, %s258_s24  }
   0x9   :  { %s47_s30 = sshll.u32 %s260_s2, 4  ;;  %s48_s30 = int_to_ptr.vmem [resolvable:$true] %s47_s30 }
   0xa   :  { %53 = dma.hbm_to_vmem [thread:$0]  %s46_s29, 256, %s48_s30, [#allocation8], %s257_s23, %s257_s23, %s258_s24  }
   0xb   :  { %250 = dma.done.wait [#allocation5], 256  }
   0xc   :  { %251 = vsyncadd [#allocation5], 4294967040 }
   0xd   :  { %252 = dma.done.wait [#allocation8], 512  }
   0xe   :  { %253 = vsyncadd [#allocation8], 4294966784  ;;  %vm70_vm0 = vcmask 7168   ;;  %v261_v0 = vmov 0.0   ;;  %v73_v1 = vld [vmem:[#allocation4] sm:$0xff]  ;;  %v75_v2 = vld [vmem:[#allocation7] sm:$0xff] }
   0xf   :  { %71 = vst.msk [vmem:[#allocation2] sm:$0xff] %vm70_vm0, %v261_v0  ;;  %v77_v3 = vld [vmem:[#allocation9] sm:$0xff]  ;;  %v79_v4 = vsub.f32 %v73_v1, %v75_v2  ;;  %v74_v6 = vld [vmem:[#allocation4 + $0x8] sm:$0xff]  ;;  %v76_v7 = vld [vmem:[#allocation7 + $0x8] sm:$0xff]  ;;  %s94_s5 = sadd.f32 1.0, %s310_s0  ;;  %v262_v33 = vmov 16.0  }
  0x10   :  { %72 = vst.msk [vmem:[#allocation2 + $0x8] sm:$0xff] %vm70_vm0, %v261_v0  ;;  %v83_v5 = vsub.f32 %v73_v1, %v77_v3  ;;  %v78_v8 = vld [vmem:[#allocation9 + $0x8] sm:$0xff]  ;;  %v80_v11 = vsub.f32 %v74_v6, %v76_v7  ;;  %164 = vrcp.f32 %v262_v33  ;;  %s140_s7 = sshll.u32 %s314_s4, 4  ;;  %s263_s11 = smov [#allocation10]   ;;  %s141_s7 = int_to_ptr.hbm [resolvable:$true] %s140_s7 }
  0x11   :  { %v81_v9 = vmul.f32 %v79_v4, %v79_v4  ;;  %v84_v12 = vsub.f32 %v74_v6, %v78_v8  ;;  %v95_v17 = vstv %s94_s5 }
  0x12   :  { %v85_v10 = vmul.f32 %v83_v5, %v83_v5  ;;  %v82_v14 = vmul.f32 %v80_v11, %v80_v11 }
  0x13   :  { %v86_v15 = vmul.f32 %v84_v12, %v84_v12 }
  0x14   :  { %v87_v13 = vsub.f32 %v81_v9, %v85_v10 }
  0x15   :  { %v88_v16 = vsub.f32 %v82_v14, %v86_v15 }
  0x16   :  { %89 = vadd.xlane.f32.xlu0 %v87_v13  ;;  %v100_v20 = vld [vmem:[#allocation2] sm:$0xff]  ;;  %v165_v34 = vpop.eup %164 }
  0x17   :  { %v101_v25 = vld [vmem:[#allocation2 + $0x8] sm:$0xff]  ;;  %v125_v35 = vmul.f32 16.0, %v165_v34  ;;  %vm129_vm1 = vweird.f32 %v165_v34 }
  0x19   :  { %v126_v36 = vsub.f32 1.0, %v125_v35 }
  0x1b   :  { %v127_v40 = vmul.f32 %v165_v34, %v126_v36 }
  0x1d   :  { %v128_v43 = vadd.f32 %v165_v34, %v127_v40 }
  0x1e   :  { %91 = vadd.xlane.f32.xlu0 %v88_v16 }
  0x1f   :  { %v130_v46 = vsel %vm129_vm1, %v165_v34, %v128_v43 }
  0x89   :  { %v90_v18 = vpop.xlane.xlu0 %89 }
  0x8a   :  { %v96_v19 = vadd.f32 %v95_v17, %v90_v18 }
  0x8c   :  { %v98_v21 = vmax.f32 %v96_v19, 0.0 }
  0x8e   :  { %v102_v22 = vadd.f32 %v100_v20, %v98_v21 }
  0x90   :  { %105 = vst.msk [vmem:[#allocation2] sm:$0xff] %vm70_vm0, %v102_v22 }
  0x91   :  { %v92_v23 = vpop.xlane.xlu0 %91 }
  0x92   :  { %v97_v24 = vadd.f32 %v95_v17, %v92_v23 }
  0x94   :  { %v99_v26 = vmax.f32 %v97_v24, 0.0 }
  0x96   :  { %v103_v27 = vadd.f32 %v101_v25, %v99_v26 }
  0x97   :  { %v110_v28 = vld [vmem:[#allocation2] sm:$0xff] }
  0x98   :  { %106 = vst.msk [vmem:[#allocation2 + $0x8] sm:$0xff] %vm70_vm0, %v103_v27  ;;  %v112_v30 = vsel %vm70_vm0, %v110_v28, 0.0 }
  0x9f   :  { %v111_v29 = vld [vmem:[#allocation2 + $0x8] sm:$0xff] }
  0xa0   :  { %v113_v31 = vsel %vm70_vm0, %v111_v29, 0.0 }
  0xa1   :  { %v114_v32 = vadd.f32 %v113_v31, %v112_v30 }
  0xa3   :  { %115 = vadd.xlane.f32.xlu1 %v114_v32 }
 0x116   :  { %v116_v37 = vpop.xlane.xlu1 %115 }
 0x117   :  { %v117_v38 = vrot.slane %v116_v37, 4 }
 0x119   :  { %v118_v39 = vadd.f32 %v117_v38, %v116_v37 }
 0x11b   :  { %v119_v41 = vrot.slane %v118_v39, 2 }
 0x11d   :  { %v120_v42 = vadd.f32 %v119_v41, %v118_v39 }
 0x11f   :  { %v121_v44 = vrot.slane %v120_v42, 1 }
 0x121   :  { %v122_v45 = vadd.f32 %v121_v44, %v120_v42 }
 0x123   :  { %152 = vpush %v122_v45 }
 0x124   :  { %154 = vpush %v130_v46 }
 0x154   :  { %s153_s8 = spop %152 }
 0x155   :  { %s155_s9 = spop %154 }
 0x156   :  { %s132_s10 = smul.f32 %s155_s9, %s153_s8 }
 0x158   :  { %134 = sst [smem:[#allocation10]] %s132_s10 }
 0x159   :  { %143 = dma.smem_to_hbm %s263_s11, 16, %s141_s7, [#allocation6]  }
 0x15a   :  { %254 = dma.done.wait [#allocation6], 16  }
 0x15b   :  { %255 = vsyncadd [#allocation6], 4294967280 }
 0x15c   :  { %148 = sfence }
 0x15d   :  { %149 = vsyncpa [#allocation5], 1 }
 0x15e   :  { %150 = vsyncpa [#allocation8], 1 }
 0x15f   :  { %151 = vsyncpa [#allocation6], 1 }

</bundles_post_ra>
